<compile_context>
chip_gen: v7x
topology: tpu7x:2x2x1
jax: 0.10.0
libtpu: 0.0.40
codegen_flags: <defaults>
</compile_context>

<pallas_src>
import functools

import jax
import jax.numpy as jnp
from jax.experimental import pallas as pl
from jax.experimental.pallas import tpu as pltpu

N_IN = 16
N_OUT = 4
HIDDEN = 256
BRANCH_DIMS = (64, 32)
BN_EPS = 1e-5
BRANCH_WIDTH = N_OUT * BRANCH_DIMS[1]   # 128 — lane-dense pre-head width
OUT_PAD = 8                             # head output padded to 8 lanes


def _round_up(n, m):
    return ((n + m - 1) // m) * m


def _default_bf16_epilogue():
    """bf16 bias+ReLU epilogue on chips with bf16 VALUs (v6e/v7x); f32 on v5*."""
    try:
        kind = jax.devices()[0].device_kind.lower()
    except Exception:
        return True
    return "v5" not in kind


def _choose_tile(b, block_batch):
    """Batch tile: sublane-aligned; >=2 grid steps for large batches (v7x 2 TCs)."""
    if b <= 512:
        tb = _round_up(b, 8)                       # single tile, minimal padding
    else:
        tb = _round_up(pl.cdiv(b, 2), 256)         # >=2 steps, MXU-aligned
    return _round_up(max(8, min(block_batch, tb)), 8)


def wavenet_kernel(x_ref, sc_ref, sh_ref, w0_ref, b0_ref, wh_ref, bh_ref,
                   w5_ref, b5_ref, wa_ref, ba_ref, wb_ref, bb_ref, out_ref,
                   *, bf16_epilogue):
    """Full WaveNet forward for one batch tile.

    x_ref:  (TB, N_IN) f32     sc/sh: (1, N_IN) f32 BatchNorm affine
    w*_ref: bf16 weights       b*_ref: bf16 (v6e/v7x) or f32 (v5e) biases
    wb_ref: (128, 8) bf16 block-diagonal head (lane-padded)   bb_ref: (1, 8) f32
    out_ref: (TB, 8) f32       (columns >= N_OUT are zero, sliced in wrapper)
    """
    bf16 = jnp.bfloat16
    f32 = jnp.float32

    def linear_relu(h_bf16, w, b):
        acc = jnp.dot(h_bf16, w, preferred_element_type=f32)
        if bf16_epilogue:
            # bf16 bias add + ReLU (bf16 VALU on v6e/v7x); result already bf16.
            return jnp.maximum(acc.astype(bf16) + b, 0.0)
        # f32 epilogue (v5e has no bf16 VALU), cast for the next MXU matmul.
        return jnp.maximum(acc + b, 0.0).astype(bf16)

    # BatchNorm as an f32 per-feature affine, then cast to bf16 for the MXU.
    xn = (x_ref[...] * sc_ref[...] + sh_ref[...]).astype(bf16)

    # Linear(n_in, 256) + ReLU
    h = linear_relu(xn, w0_ref[...], b0_ref[...])
    # 4x Linear(256, 256) + ReLU (weights stacked along axis 0; unrolled)
    for i in range(4):
        h = linear_relu(h, wh_ref[i], bh_ref[i])
    # Linear(256, 64) + ReLU
    z = linear_relu(h, w5_ref[...], b5_ref[...])
    # Fused per-branch Linear(64, 32) + ReLU for all n_out branches -> (TB, 128)
    hb = linear_relu(z, wa_ref[...], ba_ref[...])

    # Fused block-diagonal head: (TB,128) x (128,8) + bias, f32 accumulate.
    out = jnp.dot(hb, wb_ref[...], preferred_element_type=f32) + bb_ref[...]
    out_ref[...] = out.astype(out_ref.dtype)


def wavenet_forward(x, params, block_batch=4096, bf16_epilogue=None):
    """Full WaveNet forward. x: (B, N_IN) f32 -> (B, N_OUT) f32."""
    if bf16_epilogue is None:
        bf16_epilogue = _default_bf16_epilogue()
    b = x.shape[0]
    bf16, f32 = jnp.bfloat16, jnp.float32

    # ---- train-mode BatchNorm (full-batch, biased var) -> f32 affine ----
    mean = jnp.mean(x, axis=0, keepdims=True)
    var = jnp.mean((x - mean) ** 2, axis=0, keepdims=True)
    scale = (params["gamma"] * jax.lax.rsqrt(var + BN_EPS)).astype(f32)   # (1, N_IN)
    shift = (params["beta"] - mean * scale).astype(f32)                    # (1, N_IN)

    # ---- bf16 weights (f32 MXU accumulation); biases bf16 or f32 per epilogue ----
    bdt = bf16 if bf16_epilogue else f32
    w0 = params["w0"].astype(bf16); b0 = params["b0"].astype(bdt)
    wh = params["wh"].astype(bf16); bh = params["bh"].astype(bdt)
    w5 = params["w5"].astype(bf16); b5 = params["b5"].astype(bdt)
    wa = params["wa"].astype(bf16); ba = params["ba"].astype(bdt)
    # head weights lane-padded to 8 so the kernel output block is (TB, 8)
    wb = jnp.zeros((BRANCH_WIDTH, OUT_PAD), bf16).at[:, :N_OUT].set(
        params["wb"].astype(bf16))
    bb = jnp.zeros((1, OUT_PAD), f32).at[:, :N_OUT].set(params["bb"])

    # ---- batch tiling (pad batch up to a multiple of the tile, only if needed) ----
    tb = _choose_tile(b, block_batch)
    bp = _round_up(b, tb)
    xp = x if bp == b else jnp.pad(x, ((0, bp - b), (0, 0)))

    const2 = lambda i: (0, 0)
    const3 = lambda i: (0, 0, 0)

    out = pl.pallas_call(
        functools.partial(wavenet_kernel, bf16_epilogue=bf16_epilogue),
        out_shape=jax.ShapeDtypeStruct((bp, OUT_PAD), f32),
        grid=(bp // tb,),
        in_specs=[
            pl.BlockSpec((tb, N_IN), lambda i: (i, 0)),              # x tile (f32)
            pl.BlockSpec((1, N_IN), const2),                         # BN scale
            pl.BlockSpec((1, N_IN), const2),                         # BN shift
            pl.BlockSpec((N_IN, HIDDEN), const2),                    # w0 (resident)
            pl.BlockSpec((1, HIDDEN), const2),                       # b0
            pl.BlockSpec((4, HIDDEN, HIDDEN), const3),               # wh
            pl.BlockSpec((4, 1, HIDDEN), const3),                    # bh
            pl.BlockSpec((HIDDEN, BRANCH_DIMS[0]), const2),          # w5
            pl.BlockSpec((1, BRANCH_DIMS[0]), const2),               # b5
            pl.BlockSpec((BRANCH_DIMS[0], BRANCH_WIDTH), const2),    # wa
            pl.BlockSpec((1, BRANCH_WIDTH), const2),                 # ba
            pl.BlockSpec((BRANCH_WIDTH, OUT_PAD), const2),           # wb (head)
            pl.BlockSpec((1, OUT_PAD), const2),                      # bb (head)
        ],
        out_specs=pl.BlockSpec((tb, OUT_PAD), lambda i: (i, 0)),
        compiler_params=pltpu.CompilerParams(
            dimension_semantics=("parallel",),
            vmem_limit_bytes=32 * 1024 * 1024),
    )(xp, scale, shift, w0, b0, wh, bh, w5, b5, wa, ba, wb, bb)

    return out[:b, :N_OUT]


def _xavier_uniform(key, fan_in, fan_out):
    bound = (6.0 / (fan_in + fan_out)) ** 0.5
    return jax.random.uniform(key, (fan_in, fan_out), jnp.float32, -bound, bound)


def init_params(key):
    keys = jax.random.split(key, 16)
    p = {}
    p["gamma"] = jnp.ones((1, N_IN), jnp.float32)
    p["beta"] = jnp.zeros((1, N_IN), jnp.float32)

    p["w0"] = _xavier_uniform(keys[0], N_IN, HIDDEN)
    p["b0"] = jnp.zeros((1, HIDDEN), jnp.float32)

    wh = [_xavier_uniform(keys[1 + i], HIDDEN, HIDDEN) for i in range(4)]
    p["wh"] = jnp.stack(wh, axis=0)                       # (4, 256, 256)
    p["bh"] = jnp.zeros((4, 1, HIDDEN), jnp.float32)      # (4, 1, 256)

    p["w5"] = _xavier_uniform(keys[5], HIDDEN, BRANCH_DIMS[0])
    p["b5"] = jnp.zeros((1, BRANCH_DIMS[0]), jnp.float32)

    # branch Linear(64, 32) weights, concatenated along the output (lane) axis
    wa = [_xavier_uniform(keys[6 + j], BRANCH_DIMS[0], BRANCH_DIMS[1])
          for j in range(N_OUT)]
    p["wa"] = jnp.concatenate(wa, axis=1)                 # (64, n_out*32)
    p["ba"] = jnp.zeros((1, BRANCH_WIDTH), jnp.float32)

    # branch Linear(32, 1) weights, packed block-diagonally -> (n_out*32, n_out)
    wb_big = jnp.zeros((BRANCH_WIDTH, N_OUT), jnp.float32)
    for j in range(N_OUT):
        wbj = _xavier_uniform(keys[10 + j], BRANCH_DIMS[1], 1)          # (32, 1)
        wb_big = wb_big.at[j * BRANCH_DIMS[1]:(j + 1) * BRANCH_DIMS[1], j].set(wbj[:, 0])
    p["wb"] = wb_big
    p["bb"] = jnp.zeros((1, N_OUT), jnp.float32)
    return p


def wavenet_reference_f32(x, p):
    """Pure-f32 reference (matches the original module's math, modulo f64)."""
    mean = jnp.mean(x, axis=0, keepdims=True)
    var = jnp.mean((x - mean) ** 2, axis=0, keepdims=True)
    h = (x - mean) * jax.lax.rsqrt(var + BN_EPS) * p["gamma"] + p["beta"]
    h = jnp.maximum(h @ p["w0"] + p["b0"], 0.0)
    for i in range(4):
        h = jnp.maximum(h @ p["wh"][i] + p["bh"][i], 0.0)
    z = jnp.maximum(h @ p["w5"] + p["b5"], 0.0)
    hb = jnp.maximum(z @ p["wa"] + p["ba"], 0.0)
    return hb @ p["wb"] + p["bb"]


def wavenet_reference_kernel_arith(x, p, bf16_epilogue):
    """Reference that mimics the kernel's bf16-weight / f32-accumulate arithmetic."""
    bf16, f32 = jnp.bfloat16, jnp.float32
    bdt = bf16 if bf16_epilogue else f32

    def linear_relu(h, w, b):
        acc = jnp.dot(h, w.astype(bf16), preferred_element_type=f32)
        if bf16_epilogue:
            return jnp.maximum(acc.astype(bf16) + b.astype(bdt), 0.0)
        return jnp.maximum(acc + b, 0.0).astype(bf16)

    mean = jnp.mean(x, axis=0, keepdims=True)
    var = jnp.mean((x - mean) ** 2, axis=0, keepdims=True)
    scale = p["gamma"] * jax.lax.rsqrt(var + BN_EPS)
    shift = p["beta"] - mean * scale
    xn = (x * scale + shift).astype(bf16)

    h = linear_relu(xn, p["w0"], p["b0"])
    for i in range(4):
        h = linear_relu(h, p["wh"][i], p["bh"][i])
    z = linear_relu(h, p["w5"], p["b5"])
    hb = linear_relu(z, p["wa"], p["ba"])
    return jnp.dot(hb, p["wb"].astype(bf16), preferred_element_type=f32) + p["bb"]


if __name__ == "__main__":
    key = jax.random.PRNGKey(0)
    kx, kp, kx2, kx3 = jax.random.split(key, 4)

    params = init_params(kp)
    bf16_epi = _default_bf16_epilogue()

    # Small shapes consistent with the module: batch=8, n_in=16, n_out=4.
    x = jax.random.normal(kx, (8, N_IN), jnp.float32)
    out = jax.block_until_ready(wavenet_forward(x, params))
    assert out.shape == (8, N_OUT), out.shape

    ref_k = wavenet_reference_kernel_arith(x, params, bf16_epi)
    ref_f = wavenet_reference_f32(x, params)
    assert jnp.allclose(out, ref_k, atol=1e-2, rtol=1e-2), \
        float(jnp.max(jnp.abs(out - ref_k)))
    assert jnp.allclose(out, ref_f, atol=5e-2, rtol=5e-2), \
        float(jnp.max(jnp.abs(out - ref_f)))

    # Exercise the multi-tile grid + batch-padding path (batch=200, tile=64 -> grid=4).
    x2 = jax.random.normal(kx2, (200, N_IN), jnp.float32)
    out2 = jax.block_until_ready(wavenet_forward(x2, params, block_batch=64))
    assert out2.shape == (200, N_OUT), out2.shape
    ref2 = wavenet_reference_kernel_arith(x2, params, bf16_epi)
    assert jnp.allclose(out2, ref2, atol=1e-2, rtol=1e-2), \
        float(jnp.max(jnp.abs(out2 - ref2)))

    # Non-multiple-of-8 batch exercises the padding path with the default tile.
    x3 = jax.random.normal(kx3, (13, N_IN), jnp.float32)
    out3 = jax.block_until_ready(wavenet_forward(x3, params))
    assert out3.shape == (13, N_OUT), out3.shape
    ref3 = wavenet_reference_kernel_arith(x3, params, bf16_epi)
    assert jnp.allclose(out3, ref3, atol=1e-2, rtol=1e-2), \
        float(jnp.max(jnp.abs(out3 - ref3)))

    print("KERNEL_OK")
</pallas_src>

<mosaic_0001>
module attributes {stable_mosaic.version = 11 : i64} {
  func.func @wavenet_kernel(%arg0: i32, %arg1: memref<8x16xf32, #tpu.memory_space<vmem>>, %arg2: memref<1x16xf32, #tpu.memory_space<vmem>>, %arg3: memref<1x16xf32, #tpu.memory_space<vmem>>, %arg4: memref<16x256xbf16, #tpu.memory_space<vmem>>, %arg5: memref<1x256xbf16, #tpu.memory_space<vmem>>, %arg6: memref<4x256x256xbf16, #tpu.memory_space<vmem>>, %arg7: memref<4x1x256xbf16, #tpu.memory_space<vmem>>, %arg8: memref<256x64xbf16, #tpu.memory_space<vmem>>, %arg9: memref<1x64xbf16, #tpu.memory_space<vmem>>, %arg10: memref<64x128xbf16, #tpu.memory_space<vmem>>, %arg11: memref<1x128xbf16, #tpu.memory_space<vmem>>, %arg12: memref<128x8xbf16, #tpu.memory_space<vmem>>, %arg13: memref<1x8xf32, #tpu.memory_space<vmem>>, %arg14: memref<8x8xf32, #tpu.memory_space<vmem>>) attributes {dimension_semantics = [#tpu.dimension_semantics<parallel>], iteration_bounds = array<i64: 1>, scalar_prefetch = 0 : i64, scratch_operands = 0 : i64, tpu.core_type = #tpu.core_type<tc>, window_params = [{transform_indices = @transform_0, window_bounds = array<i64: 8, 16>}, {pipeline_mode = #tpu.pipeline_mode<synchronous>, transform_indices = @transform_1, window_bounds = array<i64: 1, 16>}, {pipeline_mode = #tpu.pipeline_mode<synchronous>, transform_indices = @transform_2, window_bounds = array<i64: 1, 16>}, {pipeline_mode = #tpu.pipeline_mode<synchronous>, transform_indices = @transform_3, window_bounds = array<i64: 16, 256>}, {pipeline_mode = #tpu.pipeline_mode<synchronous>, transform_indices = @transform_4, window_bounds = array<i64: 1, 256>}, {pipeline_mode = #tpu.pipeline_mode<synchronous>, transform_indices = @transform_5, window_bounds = array<i64: 4, 256, 256>}, {pipeline_mode = #tpu.pipeline_mode<synchronous>, transform_indices = @transform_6, window_bounds = array<i64: 4, 1, 256>}, {pipeline_mode = #tpu.pipeline_mode<synchronous>, transform_indices = @transform_7, window_bounds = array<i64: 256, 64>}, {pipeline_mode = #tpu.pipeline_mode<synchronous>, transform_indices = @transform_8, window_bounds = array<i64: 1, 64>}, {pipeline_mode = #tpu.pipeline_mode<synchronous>, transform_indices = @transform_9, window_bounds = array<i64: 64, 128>}, {pipeline_mode = #tpu.pipeline_mode<synchronous>, transform_indices = @transform_10, window_bounds = array<i64: 1, 128>}, {pipeline_mode = #tpu.pipeline_mode<synchronous>, transform_indices = @transform_11, window_bounds = array<i64: 128, 8>}, {pipeline_mode = #tpu.pipeline_mode<synchronous>, transform_indices = @transform_12, window_bounds = array<i64: 1, 8>}, {transform_indices = @transform_13, window_bounds = array<i64: 8, 8>}]} {
    %c0 = arith.constant 0 : index
    %c0_0 = arith.constant 0 : index
    %0 = vector.load %arg1[%c0, %c0_0] : memref<8x16xf32, #tpu.memory_space<vmem>>, vector<8x16xf32>
    %c0_1 = arith.constant 0 : index
    %c0_2 = arith.constant 0 : index
    %1 = vector.load %arg2[%c0_1, %c0_2] : memref<1x16xf32, #tpu.memory_space<vmem>>, vector<1x16xf32>
    %2 = vector.broadcast %1 : vector<1x16xf32> to vector<8x16xf32>
    %3 = arith.mulf %0, %2 : vector<8x16xf32>
    %c0_3 = arith.constant 0 : index
    %c0_4 = arith.constant 0 : index
    %4 = vector.load %arg3[%c0_3, %c0_4] : memref<1x16xf32, #tpu.memory_space<vmem>>, vector<1x16xf32>
    %5 = vector.broadcast %4 : vector<1x16xf32> to vector<8x16xf32>
    %6 = arith.addf %3, %5 : vector<8x16xf32>
    %7 = arith.truncf %6 : vector<8x16xf32> to vector<8x16xbf16>
    %c0_5 = arith.constant 0 : index
    %c0_6 = arith.constant 0 : index
    %8 = vector.load %arg4[%c0_5, %c0_6] : memref<16x256xbf16, #tpu.memory_space<vmem>>, vector<16x256xbf16>
    %c0_7 = arith.constant 0 : index
    %c0_8 = arith.constant 0 : index
    %9 = vector.load %arg5[%c0_7, %c0_8] : memref<1x256xbf16, #tpu.memory_space<vmem>>, vector<1x256xbf16>
    %cst = arith.constant dense<0.000000e+00> : vector<8x256xf32>
    %10 = tpu.matmul %7, %8, %cst {dimension_numbers = #tpu.dot_dimension_numbers<[1], [0], [0], [1], [0, 0, 1, 1], [], []>} : vector<8x16xbf16>, vector<16x256xbf16>, vector<8x256xf32> -> vector<8x256xf32>
    %11 = arith.truncf %10 : vector<8x256xf32> to vector<8x256xbf16>
    %12 = vector.broadcast %9 : vector<1x256xbf16> to vector<8x256xbf16>
    %13 = arith.addf %11, %12 : vector<8x256xbf16>
    %cst_9 = arith.constant 0.000000e+00 : bf16
    %14 = vector.broadcast %cst_9 : bf16 to vector<8x256xbf16>
    %15 = arith.maximumf %13, %14 : vector<8x256xbf16>
    %c0_10 = arith.constant 0 : index
    %c0_11 = arith.constant 0 : index
    %c0_12 = arith.constant 0 : index
    %16 = vector.load %arg6[%c0_10, %c0_11, %c0_12] : memref<4x256x256xbf16, #tpu.memory_space<vmem>>, vector<1x256x256xbf16>
    %17 = vector.shape_cast %16 : vector<1x256x256xbf16> to vector<256x256xbf16>
    %c0_13 = arith.constant 0 : index
    %c0_14 = arith.constant 0 : index
    %c0_15 = arith.constant 0 : index
    %18 = vector.load %arg7[%c0_13, %c0_14, %c0_15] : memref<4x1x256xbf16, #tpu.memory_space<vmem>>, vector<1x1x256xbf16>
    %19 = vector.shape_cast %18 : vector<1x1x256xbf16> to vector<1x256xbf16>
    %cst_16 = arith.constant dense<0.000000e+00> : vector<8x256xf32>
    %20 = tpu.matmul %15, %17, %cst_16 {dimension_numbers = #tpu.dot_dimension_numbers<[1], [0], [0], [1], [0, 0, 1, 1], [], []>} : vector<8x256xbf16>, vector<256x256xbf16>, vector<8x256xf32> -> vector<8x256xf32>
    %21 = arith.truncf %20 : vector<8x256xf32> to vector<8x256xbf16>
    %22 = vector.broadcast %19 : vector<1x256xbf16> to vector<8x256xbf16>
    %23 = arith.addf %21, %22 : vector<8x256xbf16>
    %cst_17 = arith.constant 0.000000e+00 : bf16
    %24 = vector.broadcast %cst_17 : bf16 to vector<8x256xbf16>
    %25 = arith.maximumf %23, %24 : vector<8x256xbf16>
    %c1 = arith.constant 1 : index
    %c0_18 = arith.constant 0 : index
    %c0_19 = arith.constant 0 : index
    %26 = vector.load %arg6[%c1, %c0_18, %c0_19] : memref<4x256x256xbf16, #tpu.memory_space<vmem>>, vector<1x256x256xbf16>
    %27 = vector.shape_cast %26 : vector<1x256x256xbf16> to vector<256x256xbf16>
    %c1_20 = arith.constant 1 : index
    %c0_21 = arith.constant 0 : index
    %c0_22 = arith.constant 0 : index
    %28 = vector.load %arg7[%c1_20, %c0_21, %c0_22] : memref<4x1x256xbf16, #tpu.memory_space<vmem>>, vector<1x1x256xbf16>
    %29 = vector.shape_cast %28 : vector<1x1x256xbf16> to vector<1x256xbf16>
    %cst_23 = arith.constant dense<0.000000e+00> : vector<8x256xf32>
    %30 = tpu.matmul %25, %27, %cst_23 {dimension_numbers = #tpu.dot_dimension_numbers<[1], [0], [0], [1], [0, 0, 1, 1], [], []>} : vector<8x256xbf16>, vector<256x256xbf16>, vector<8x256xf32> -> vector<8x256xf32>
    %31 = arith.truncf %30 : vector<8x256xf32> to vector<8x256xbf16>
    %32 = vector.broadcast %29 : vector<1x256xbf16> to vector<8x256xbf16>
    %33 = arith.addf %31, %32 : vector<8x256xbf16>
    %cst_24 = arith.constant 0.000000e+00 : bf16
    %34 = vector.broadcast %cst_24 : bf16 to vector<8x256xbf16>
    %35 = arith.maximumf %33, %34 : vector<8x256xbf16>
    %c2 = arith.constant 2 : index
    %c0_25 = arith.constant 0 : index
    %c0_26 = arith.constant 0 : index
    %36 = vector.load %arg6[%c2, %c0_25, %c0_26] : memref<4x256x256xbf16, #tpu.memory_space<vmem>>, vector<1x256x256xbf16>
    %37 = vector.shape_cast %36 : vector<1x256x256xbf16> to vector<256x256xbf16>
    %c2_27 = arith.constant 2 : index
    %c0_28 = arith.constant 0 : index
    %c0_29 = arith.constant 0 : index
    %38 = vector.load %arg7[%c2_27, %c0_28, %c0_29] : memref<4x1x256xbf16, #tpu.memory_space<vmem>>, vector<1x1x256xbf16>
    %39 = vector.shape_cast %38 : vector<1x1x256xbf16> to vector<1x256xbf16>
    %cst_30 = arith.constant dense<0.000000e+00> : vector<8x256xf32>
    %40 = tpu.matmul %35, %37, %cst_30 {dimension_numbers = #tpu.dot_dimension_numbers<[1], [0], [0], [1], [0, 0, 1, 1], [], []>} : vector<8x256xbf16>, vector<256x256xbf16>, vector<8x256xf32> -> vector<8x256xf32>
    %41 = arith.truncf %40 : vector<8x256xf32> to vector<8x256xbf16>
    %42 = vector.broadcast %39 : vector<1x256xbf16> to vector<8x256xbf16>
    %43 = arith.addf %41, %42 : vector<8x256xbf16>
    %cst_31 = arith.constant 0.000000e+00 : bf16
    %44 = vector.broadcast %cst_31 : bf16 to vector<8x256xbf16>
    %45 = arith.maximumf %43, %44 : vector<8x256xbf16>
    %c3 = arith.constant 3 : index
    %c0_32 = arith.constant 0 : index
    %c0_33 = arith.constant 0 : index
    %46 = vector.load %arg6[%c3, %c0_32, %c0_33] : memref<4x256x256xbf16, #tpu.memory_space<vmem>>, vector<1x256x256xbf16>
    %47 = vector.shape_cast %46 : vector<1x256x256xbf16> to vector<256x256xbf16>
    %c3_34 = arith.constant 3 : index
    %c0_35 = arith.constant 0 : index
    %c0_36 = arith.constant 0 : index
    %48 = vector.load %arg7[%c3_34, %c0_35, %c0_36] : memref<4x1x256xbf16, #tpu.memory_space<vmem>>, vector<1x1x256xbf16>
    %49 = vector.shape_cast %48 : vector<1x1x256xbf16> to vector<1x256xbf16>
    %cst_37 = arith.constant dense<0.000000e+00> : vector<8x256xf32>
    %50 = tpu.matmul %45, %47, %cst_37 {dimension_numbers = #tpu.dot_dimension_numbers<[1], [0], [0], [1], [0, 0, 1, 1], [], []>} : vector<8x256xbf16>, vector<256x256xbf16>, vector<8x256xf32> -> vector<8x256xf32>
    %51 = arith.truncf %50 : vector<8x256xf32> to vector<8x256xbf16>
    %52 = vector.broadcast %49 : vector<1x256xbf16> to vector<8x256xbf16>
    %53 = arith.addf %51, %52 : vector<8x256xbf16>
    %cst_38 = arith.constant 0.000000e+00 : bf16
    %54 = vector.broadcast %cst_38 : bf16 to vector<8x256xbf16>
    %55 = arith.maximumf %53, %54 : vector<8x256xbf16>
    %c0_39 = arith.constant 0 : index
    %c0_40 = arith.constant 0 : index
    %56 = vector.load %arg8[%c0_39, %c0_40] : memref<256x64xbf16, #tpu.memory_space<vmem>>, vector<256x64xbf16>
    %c0_41 = arith.constant 0 : index
    %c0_42 = arith.constant 0 : index
    %57 = vector.load %arg9[%c0_41, %c0_42] : memref<1x64xbf16, #tpu.memory_space<vmem>>, vector<1x64xbf16>
    %cst_43 = arith.constant dense<0.000000e+00> : vector<8x64xf32>
    %58 = tpu.matmul %55, %56, %cst_43 {dimension_numbers = #tpu.dot_dimension_numbers<[1], [0], [0], [1], [0, 0, 1, 1], [], []>} : vector<8x256xbf16>, vector<256x64xbf16>, vector<8x64xf32> -> vector<8x64xf32>
    %59 = arith.truncf %58 : vector<8x64xf32> to vector<8x64xbf16>
    %60 = vector.broadcast %57 : vector<1x64xbf16> to vector<8x64xbf16>
    %61 = arith.addf %59, %60 : vector<8x64xbf16>
    %cst_44 = arith.constant 0.000000e+00 : bf16
    %62 = vector.broadcast %cst_44 : bf16 to vector<8x64xbf16>
    %63 = arith.maximumf %61, %62 : vector<8x64xbf16>
    %c0_45 = arith.constant 0 : index
    %c0_46 = arith.constant 0 : index
    %64 = vector.load %arg10[%c0_45, %c0_46] : memref<64x128xbf16, #tpu.memory_space<vmem>>, vector<64x128xbf16>
    %c0_47 = arith.constant 0 : index
    %c0_48 = arith.constant 0 : index
    %65 = vector.load %arg11[%c0_47, %c0_48] : memref<1x128xbf16, #tpu.memory_space<vmem>>, vector<1x128xbf16>
    %cst_49 = arith.constant dense<0.000000e+00> : vector<8x128xf32>
    %66 = tpu.matmul %63, %64, %cst_49 {dimension_numbers = #tpu.dot_dimension_numbers<[1], [0], [0], [1], [0, 0, 1, 1], [], []>} : vector<8x64xbf16>, vector<64x128xbf16>, vector<8x128xf32> -> vector<8x128xf32>
    %67 = arith.truncf %66 : vector<8x128xf32> to vector<8x128xbf16>
    %68 = vector.broadcast %65 : vector<1x128xbf16> to vector<8x128xbf16>
    %69 = arith.addf %67, %68 : vector<8x128xbf16>
    %cst_50 = arith.constant 0.000000e+00 : bf16
    %70 = vector.broadcast %cst_50 : bf16 to vector<8x128xbf16>
    %71 = arith.maximumf %69, %70 : vector<8x128xbf16>
    %c0_51 = arith.constant 0 : index
    %c0_52 = arith.constant 0 : index
    %72 = vector.load %arg12[%c0_51, %c0_52] : memref<128x8xbf16, #tpu.memory_space<vmem>>, vector<128x8xbf16>
    %cst_53 = arith.constant dense<0.000000e+00> : vector<8x8xf32>
    %73 = tpu.matmul %71, %72, %cst_53 {dimension_numbers = #tpu.dot_dimension_numbers<[1], [0], [0], [1], [0, 0, 1, 1], [], []>} : vector<8x128xbf16>, vector<128x8xbf16>, vector<8x8xf32> -> vector<8x8xf32>
    %c0_54 = arith.constant 0 : index
    %c0_55 = arith.constant 0 : index
    %74 = vector.load %arg13[%c0_54, %c0_55] : memref<1x8xf32, #tpu.memory_space<vmem>>, vector<1x8xf32>
    %75 = vector.broadcast %74 : vector<1x8xf32> to vector<8x8xf32>
    %76 = arith.addf %73, %75 : vector<8x8xf32>
    %c0_56 = arith.constant 0 : index
    %c0_57 = arith.constant 0 : index
    %77 = vector.load %arg14[%c0_56, %c0_57] : memref<8x8xf32, #tpu.memory_space<vmem>>, vector<8x8xf32>
    tpu.vector_store %arg14[%c0_56, %c0_57], %76 {strides = array<i32>} : memref<8x8xf32, #tpu.memory_space<vmem>>, vector<8x8xf32>,
    return
  }
  func.func @transform_0(%arg0: i32) -> (i32, i32) {
    %c0_i32 = arith.constant 0 : i32
    %c0_i32_0 = arith.constant 0 : i32
    return %arg0, %c0_i32 : i32, i32
  }
  func.func @transform_1(%arg0: i32) -> (i32, i32) {
    %c0_i32 = arith.constant 0 : i32
    %c0_i32_0 = arith.constant 0 : i32
    %c0_i32_1 = arith.constant 0 : i32
    return %c0_i32, %c0_i32_0 : i32, i32
  }
  func.func @transform_2(%arg0: i32) -> (i32, i32) {
    %c0_i32 = arith.constant 0 : i32
    %c0_i32_0 = arith.constant 0 : i32
    %c0_i32_1 = arith.constant 0 : i32
    return %c0_i32, %c0_i32_0 : i32, i32
  }
  func.func @transform_3(%arg0: i32) -> (i32, i32) {
    %c0_i32 = arith.constant 0 : i32
    %c0_i32_0 = arith.constant 0 : i32
    %c0_i32_1 = arith.constant 0 : i32
    return %c0_i32, %c0_i32_0 : i32, i32
  }
  func.func @transform_4(%arg0: i32) -> (i32, i32) {
    %c0_i32 = arith.constant 0 : i32
    %c0_i32_0 = arith.constant 0 : i32
    %c0_i32_1 = arith.constant 0 : i32
    return %c0_i32, %c0_i32_0 : i32, i32
  }
  func.func @transform_5(%arg0: i32) -> (i32, i32, i32) {
    %c0_i32 = arith.constant 0 : i32
    %c0_i32_0 = arith.constant 0 : i32
    %c0_i32_1 = arith.constant 0 : i32
    %c0_i32_2 = arith.constant 0 : i32
    return %c0_i32, %c0_i32_0, %c0_i32_1 : i32, i32, i32
  }
  func.func @transform_6(%arg0: i32) -> (i32, i32, i32) {
    %c0_i32 = arith.constant 0 : i32
    %c0_i32_0 = arith.constant 0 : i32
    %c0_i32_1 = arith.constant 0 : i32
    %c0_i32_2 = arith.constant 0 : i32
    return %c0_i32, %c0_i32_0, %c0_i32_1 : i32, i32, i32
  }
  func.func @transform_7(%arg0: i32) -> (i32, i32) {
    %c0_i32 = arith.constant 0 : i32
    %c0_i32_0 = arith.constant 0 : i32
    %c0_i32_1 = arith.constant 0 : i32
    return %c0_i32, %c0_i32_0 : i32, i32
  }
  func.func @transform_8(%arg0: i32) -> (i32, i32) {
    %c0_i32 = arith.constant 0 : i32
    %c0_i32_0 = arith.constant 0 : i32
    %c0_i32_1 = arith.constant 0 : i32
    return %c0_i32, %c0_i32_0 : i32, i32
  }
  func.func @transform_9(%arg0: i32) -> (i32, i32) {
    %c0_i32 = arith.constant 0 : i32
    %c0_i32_0 = arith.constant 0 : i32
    %c0_i32_1 = arith.constant 0 : i32
    return %c0_i32, %c0_i32_0 : i32, i32
  }
  func.func @transform_10(%arg0: i32) -> (i32, i32) {
    %c0_i32 = arith.constant 0 : i32
    %c0_i32_0 = arith.constant 0 : i32
    %c0_i32_1 = arith.constant 0 : i32
    return %c0_i32, %c0_i32_0 : i32, i32
  }
  func.func @transform_11(%arg0: i32) -> (i32, i32) {
    %c0_i32 = arith.constant 0 : i32
    %c0_i32_0 = arith.constant 0 : i32
    %c0_i32_1 = arith.constant 0 : i32
    return %c0_i32, %c0_i32_0 : i32, i32
  }
  func.func @transform_12(%arg0: i32) -> (i32, i32) {
    %c0_i32 = arith.constant 0 : i32
    %c0_i32_0 = arith.constant 0 : i32
    %c0_i32_1 = arith.constant 0 : i32
    return %c0_i32, %c0_i32_0 : i32, i32
  }
  func.func @transform_13(%arg0: i32) -> (i32, i32) {
    %c0_i32 = arith.constant 0 : i32
    %c0_i32_0 = arith.constant 0 : i32
    return %arg0, %c0_i32 : i32, i32
  }
}

</mosaic_0001>

<bundles_post_ra>
// kernel: tpu_custom_call.1
= control target key start
LH: loop header
LB: loop body
LE: loop exit
PB: predicated region body
PF: predicated region fallthrough
CT: control target
= control target key end

     0   :  { %18 = vsyncpa [#allocation3], 0  ;;  %s2485_s0 = inlined_call_operand.vmem [shape: f32[8,16], index: 0, kind: input, shape index: {}]   ;;  %s2486_s1 = inlined_call_operand.vmem [shape: f32[1,16], index: 1, kind: input, shape index: {}]   ;;  %s2487_s2 = inlined_call_operand.vmem [shape: f32[1,16], index: 2, kind: input, shape index: {}]   ;;  %s2488_s3 = inlined_call_operand.vmem [shape: bf16[16,256], index: 3, kind: input, shape index: {}]   ;;  %s2489_s4 = inlined_call_operand.vmem [shape: bf16[1,256], index: 4, kind: input, shape index: {}]   ;;  %s2490_s5 = inlined_call_operand.hbm [shape: bf16[4,256,256], index: 5, kind: input, shape index: {}]   ;;  %s2491_s6 = inlined_call_operand.vmem [shape: bf16[4,1,256], index: 6, kind: input, shape index: {}]   ;;  %s2492_s7 = inlined_call_operand.vmem [shape: bf16[256,64], index: 7, kind: input, shape index: {}]   ;;  %s2493_s8 = inlined_call_operand.vmem [shape: bf16[1,64], index: 8, kind: input, shape index: {}]   ;;  %s2494_s9 = inlined_call_operand.vmem [shape: bf16[64,128], index: 9, kind: input, shape index: {}]   ;;  %s2495_s10 = inlined_call_operand.vmem [shape: bf16[1,128], index: 10, kind: input, shape index: {}]   ;;  %s2496_s11 = inlined_call_operand.vmem [shape: bf16[128,8], index: 11, kind: input, shape index: {}]   ;;  %s2497_s12 = inlined_call_operand.vmem [shape: f32[1,8], index: 12, kind: input, shape index: {}]   ;;  %s2498_s13 = inlined_call_operand.hbm [shape: f32[8,8], index: 13, kind: output, shape index: {}]  }
   0x1   :  { %19 = vsyncpa [#allocation4], 0  ;;  %s2205_s25 = smov [#allocation2]   ;;  %s2157_s29 = scalar_lea.hbm %s2490_s5, 16384 }
   0x2   :  { %s35_s26 = sshll.u32 %s2205_s25, 4  ;;  %p2158_p0 = scmp.ne.s32.totalorder %s2490_s5, %s2157_s29  ;;  %s36_s26 = int_to_ptr.vmem [resolvable:$true] %s35_s26 }
   0x3   :  { %p2161_p1 = scmp.lt.u32.totalorder %s2157_s29, %s2490_s5 }
   0x5   :  { %p2163_p2 = pnand %p2161_p1, %p2158_p0 }
   0x7   :  { %2166 = shalt.err (!%p2163_p2)
}
   0x8   :  { %s2167_s17 = scalar_lea.vmem %s36_s26, 16384  ;;  %p2172_p4 = scmp.lt.s32.totalorder %s36_s26, %s36_s26 }
   0x9   :  { %p2168_p3 = scmp.ne.s32.totalorder %s36_s26, %s2167_s17  ;;  %p2173_p5 = scmp.lt.s32.totalorder %s2167_s17, %s2167_s17 }
   0xb   :  { %p2174_p6 = por %p2173_p5, %p2172_p4 }
   0xd   :  { %p2175_p7 = pnand %p2174_p6, %p2168_p3 }
   0xf   :  { %2178 = shalt.err (!%p2175_p7)
}
  0x10   :  { %s2206_s18 = smov 128   ;;  %s2207_s19 = smov 8  }
  0x11   :  { %41 = dma.hbm_to_vmem [thread:$0]  %s2490_s5, 16384, %s36_s26, [#allocation3], %s2206_s18, %s2206_s18, %s2207_s19  }
  0x12   :  { %2201 = dma.done.wait [#allocation3], 16384  }
  0x13   :  { %2202 = vsyncadd [#allocation3], 4294950912  ;;  %v2208_v0 = vmov 0   ;;  %v1934_v1 = vld [vmem:[%s2488_s3 + $0x4] ss:$8 sps:$4 sm:$0xff]   ;;  %vm91_vm0 = vcmask 130048  }
  0x14   :  { %127 = vmatprep.mubr.bf16.mxu1 %v2208_v0  ;;  %v1936_v2 = vld [vmem:[%s2488_s3] ss:$8 sps:$4 sm:$0xff]   ;;  %95 = vmatprep.subr.bf16.mxu1 %v1934_v1  ;;  %v1939_v7 = vld [vmem:[#allocation2 + $0x4] ss:$8 sps:$4 sm:$0xff]   ;;  %v1942_v11 = vld [vmem:[#allocation2 + $0x14] ss:$8 sps:$4 sm:$0xff]  }
  0x15   :  { %v60_v3 = vld [vmem:[%s2485_s0] sm:$0xff]  ;;  %96 = vmatpush1.bf16.msra.mxu1 %v1936_v2  ;;  %v1940_v12 = vld [vmem:[#allocation2 + $0x10] ss:$8 sps:$4 sm:$0xff]   ;;  %v1948_v15 = vld [vmem:[#allocation2 + $0x34] ss:$8 sps:$4 sm:$0xff]   ;;  %vm2211_vm1 = vmmov 0  }
  0x16   :  { %v1687_v4 = vld [vmem:[%s2486_s1] ss:$0 sm:$0xff]  ;;  %372 = vmatprep.subr.bf16.mxu1 %v1939_v7  ;;  %v1945_v13 = vld [vmem:[#allocation2 + $0x24] ss:$8 sps:$4 sm:$0xff]   ;;  %v1946_v16 = vld [vmem:[#allocation2 + $0x30] ss:$8 sps:$4 sm:$0xff]  }
  0x17   :  { %v68_v5 = vmul.f32 %v1687_v4, %v60_v3  ;;  %v1688_v6 = vld [vmem:[%s2487_s2] ss:$0 sm:$0xff]  ;;  %v1951_v17 = vld [vmem:[#allocation2 + $0x44] ss:$8 sps:$4 sm:$0xff]   ;;  %v1954_v19 = vld [vmem:[#allocation2 + $0x54] ss:$8 sps:$4 sm:$0xff]  }
  0x18   :  { %v1937_v9 = vld [vmem:[#allocation2] ss:$8 sps:$4 sm:$0xff]   ;;  %v1952_v20 = vld [vmem:[#allocation2 + $0x50] ss:$8 sps:$4 sm:$0xff]   ;;  %v1957_v21 = vld [vmem:[#allocation2 + $0x64] ss:$8 sps:$4 sm:$0xff]  }
  0x19   :  { %v76_v8 = vadd.f32 %v1688_v6, %v68_v5  ;;  %v1943_v14 = vld [vmem:[#allocation2 + $0x20] ss:$8 sps:$4 sm:$0xff]   ;;  %v1960_v23 = vld [vmem:[#allocation2 + $0x74] ss:$8 sps:$4 sm:$0xff]   ;;  %v1958_v24 = vld [vmem:[#allocation2 + $0x70] ss:$8 sps:$4 sm:$0xff]  }
  0x1a   :  { %v1949_v18 = vld [vmem:[#allocation2 + $0x40] ss:$8 sps:$4 sm:$0xff]   ;;  %v1963_v25 = vld [vmem:[#allocation2 + $0x84] ss:$8 sps:$4 sm:$0xff]   ;;  %v1966_v27 = vld [vmem:[#allocation2 + $0x94] ss:$8 sps:$4 sm:$0xff]  }
  0x1b   :  { %v77_v10 = vpack.c.bf16 %v76_v8, %v76_v8  ;;  %v1955_v22 = vld [vmem:[#allocation2 + $0x60] ss:$8 sps:$4 sm:$0xff]   ;;  %v1964_v28 = vld [vmem:[#allocation2 + $0x90] ss:$8 sps:$4 sm:$0xff]   ;;  %v1969_v29 = vld [vmem:[#allocation2 + $0xa4] ss:$8 sps:$4 sm:$0xff]   ;;  %v150_v8 = vlaneseq }
  0x1c   :  { %v1961_v26 = vld [vmem:[#allocation2 + $0x80] ss:$8 sps:$4 sm:$0xff]   ;;  %v1972_v31 = vld [vmem:[#allocation2 + $0xb4] ss:$8 sps:$4 sm:$0xff]   ;;  %v1970_v32 = vld [vmem:[#allocation2 + $0xb0] ss:$8 sps:$4 sm:$0xff]  }
  0x1d   :  { %1691 = vmatmul.mubr.msk.bf16.vlgmr.msra.gmra.mrb[0].mxu1 %vm91_vm0, %v77_v10  ;;  %v1967_v30 = vld [vmem:[#allocation2 + $0xa0] ss:$8 sps:$4 sm:$0xff]   ;;  %v1975_v33 = vld [vmem:[#allocation2 + $0xc4] ss:$8 sps:$4 sm:$0xff]   ;;  %v1978_v35 = vld [vmem:[#allocation2 + $0xd4] ss:$8 sps:$4 sm:$0xff]  }
  0x1e   :  { %373 = vmatpush1.bf16.msra.mxu1 %v1937_v9  ;;  %v1973_v34 = vld [vmem:[#allocation2 + $0xc0] ss:$8 sps:$4 sm:$0xff]   ;;  %v1976_v36 = vld [vmem:[#allocation2 + $0xd0] ss:$8 sps:$4 sm:$0xff]   ;;  %v1981_v37 = vld [vmem:[#allocation2 + $0xe4] ss:$8 sps:$4 sm:$0xff]  }
  0x1f   :  { %374 = vmatprep.subr.bf16.mxu1 %v1942_v11  ;;  %v1979_v38 = vld [vmem:[#allocation2 + $0xe0] ss:$8 sps:$4 sm:$0xff]   ;;  %v1984_v39 = vld [vmem:[#allocation2 + $0xf4] ss:$8 sps:$4 sm:$0xff]   ;;  %v1982_v40 = vld [vmem:[#allocation2 + $0xf0] ss:$8 sps:$4 sm:$0xff]  }
  0x20   :  { %v1985_v41 = vld [vmem:[#allocation2 + $0x104] ss:$8 sps:$4 sm:$0xff]   ;;  %v1987_v42 = vld [vmem:[#allocation2 + $0x100] ss:$8 sps:$4 sm:$0xff]   ;;  %v1988_v43 = vld [vmem:[#allocation2 + $0x114] ss:$8 sps:$4 sm:$0xff]  }
  0x21   :  { %651 = vmatprep.subr.bf16.mxu0 %v1985_v41  ;;  %v1990_v44 = vld [vmem:[#allocation2 + $0x110] ss:$8 sps:$4 sm:$0xff]   ;;  %v1991_v45 = vld [vmem:[#allocation2 + $0x124] ss:$8 sps:$4 sm:$0xff]   ;;  %v1993_v46 = vld [vmem:[#allocation2 + $0x120] ss:$8 sps:$4 sm:$0xff]  }
  0x22   :  { %375 = vmatpush1.bf16.msra.mxu1 %v1940_v12  ;;  %652 = vmatpush1.bf16.msra.mxu0 %v1987_v42  ;;  %v1994_v47 = vld [vmem:[#allocation2 + $0x134] ss:$8 sps:$4 sm:$0xff]   ;;  %v1996_v48 = vld [vmem:[#allocation2 + $0x130] ss:$8 sps:$4 sm:$0xff]   ;;  %v1997_v49 = vld [vmem:[#allocation2 + $0x144] ss:$8 sps:$4 sm:$0xff]  }
  0x23   :  { %376 = vmatprep.subr.bf16.mxu1 %v1945_v13  ;;  %653 = vmatprep.subr.bf16.mxu0 %v1988_v43  ;;  %v1999_v50 = vld [vmem:[#allocation2 + $0x140] ss:$8 sps:$4 sm:$0xff]   ;;  %v2000_v51 = vld [vmem:[#allocation2 + $0x154] ss:$8 sps:$4 sm:$0xff]   ;;  %v2002_v52 = vld [vmem:[#allocation2 + $0x150] ss:$8 sps:$4 sm:$0xff]  }
  0x24   :  { %v2003_v53 = vld [vmem:[#allocation2 + $0x164] ss:$8 sps:$4 sm:$0xff]   ;;  %v2005_v54 = vld [vmem:[#allocation2 + $0x160] ss:$8 sps:$4 sm:$0xff]   ;;  %v2006_v55 = vld [vmem:[#allocation2 + $0x174] ss:$8 sps:$4 sm:$0xff]  }
  0x25   :  { %v2008_v56 = vld [vmem:[#allocation2 + $0x170] ss:$8 sps:$4 sm:$0xff]   ;;  %v2009_v57 = vld [vmem:[#allocation2 + $0x184] ss:$8 sps:$4 sm:$0xff]   ;;  %v2011_v58 = vld [vmem:[#allocation2 + $0x180] ss:$8 sps:$4 sm:$0xff]  }
  0x26   :  { %377 = vmatpush1.bf16.msra.mxu1 %v1943_v14  ;;  %654 = vmatpush1.bf16.msra.mxu0 %v1990_v44  ;;  %v2012_v59 = vld [vmem:[#allocation2 + $0x194] ss:$8 sps:$4 sm:$0xff]   ;;  %v2014_v60 = vld [vmem:[#allocation2 + $0x190] ss:$8 sps:$4 sm:$0xff]   ;;  %v2015_v61 = vld [vmem:[#allocation2 + $0x1a4] ss:$8 sps:$4 sm:$0xff]  }
  0x27   :  { %378 = vmatprep.subr.bf16.mxu1 %v1948_v15  ;;  %655 = vmatprep.subr.bf16.mxu0 %v1991_v45  ;;  %v2017_v62 = vld [vmem:[#allocation2 + $0x1a0] ss:$8 sps:$4 sm:$0xff]   ;;  %v2018_v63 = vld [vmem:[#allocation2 + $0x1b4] ss:$8 sps:$4 sm:$0xff]   ;;  %v2020_v1 = vld [vmem:[#allocation2 + $0x1b0] ss:$8 sps:$4 sm:$0xff]  }
  0x28   :  { %v2021_v2 = vld [vmem:[#allocation2 + $0x1c4] ss:$8 sps:$4 sm:$0xff]   ;;  %v2023_v3 = vld [vmem:[#allocation2 + $0x1c0] ss:$8 sps:$4 sm:$0xff]   ;;  %v2024_v4 = vld [vmem:[#allocation2 + $0x1d4] ss:$8 sps:$4 sm:$0xff]  }
  0x29   :  { %v2026_v5 = vld [vmem:[#allocation2 + $0x1d0] ss:$8 sps:$4 sm:$0xff]   ;;  %v2209_v6 = vmov 1966171168   ;;  %v151_v10 = vshrl.u32 %v150_v8, 7  ;;  %vm1505_vm2 = vcmask 523264  }
  0x2a   :  { %379 = vmatpush1.bf16.msra.mxu1 %v1946_v16  ;;  %656 = vmatpush1.bf16.msra.mxu0 %v1993_v46  ;;  %v148_v7 = vunpack.c.l.s4 %v2209_v6  ;;  %v1692_v11 = vld.sshfl [vmem:[%s2489_s4] sm:$0x11 pattern:$0x75316420]  ;;  %v2044_v41 = vld [vmem:[#allocation2 + $0x234] ss:$8 sps:$4 sm:$0xff]  }
  0x2b   :  { %380 = vmatprep.subr.bf16.mxu1 %v1951_v17  ;;  %657 = vmatprep.subr.bf16.mxu0 %v1994_v47  ;;  %v146_v13 = vcombine.high %v1692_v11, %v1692_v11  ;;  %v2318_v17 = vsub.s32 0, %v151_v10  ;;  %v2042_v42 = vld [vmem:[#allocation2 + $0x230] ss:$8 sps:$4 sm:$0xff]   ;;  %v2047_v43 = vld [vmem:[#allocation2 + $0x244] ss:$8 sps:$4 sm:$0xff]   ;;  %vm1670_vm3 = vcmask 64512  }
  0x2c   :  { %v149_v9 = vunpack.c.0.s8 %v148_v7  ;;  %v2045_v44 = vld [vmem:[#allocation2 + $0x240] ss:$8 sps:$4 sm:$0xff]   ;;  %v2050_v45 = vld [vmem:[#allocation2 + $0x254] ss:$8 sps:$4 sm:$0xff]   ;;  %v2048_v46 = vld [vmem:[#allocation2 + $0x250] ss:$8 sps:$4 sm:$0xff]  }
  0x2d   :  { %v2053_v47 = vld [vmem:[#allocation2 + $0x264] ss:$8 sps:$4 sm:$0xff]  }
  0x2e   :  { %381 = vmatpush1.bf16.msra.mxu1 %v1949_v18  ;;  %658 = vmatpush1.bf16.msra.mxu0 %v1996_v48  ;;  %v2314_v12 = vsub.s32 %v149_v9, %v151_v10  ;;  %v2051_v48 = vld [vmem:[#allocation2 + $0x260] ss:$8 sps:$4 sm:$0xff]  }
  0x2f   :  { %382 = vmatprep.subr.bf16.mxu1 %v1954_v19  ;;  %659 = vmatprep.subr.bf16.mxu0 %v1997_v49  ;;  %v2056_v49 = vld [vmem:[#allocation2 + $0x274] ss:$8 sps:$4 sm:$0xff]  }
  0x30   :  { %v153_v14 = vrot.slane %v1692_v11, %v2314_v12  ;;  %v160_v15 = vrot.slane %v146_v13, %v2314_v12 }
  0x32   :  { %383 = vmatpush1.bf16.msra.mxu1 %v1952_v20  ;;  %660 = vmatpush1.bf16.msra.mxu0 %v1999_v50  ;;  %v162_v16 = vpack.i.b16 %v153_v14, %v153_v14  ;;  %v169_v18 = vpack.i.b16 %v160_v15, %v160_v15  ;;  %v2054_v50 = vld [vmem:[#allocation2 + $0x270] ss:$8 sps:$4 sm:$0xff]  }
  0x33   :  { %384 = vmatprep.subr.bf16.mxu1 %v1957_v21  ;;  %661 = vmatprep.subr.bf16.mxu0 %v2000_v51  ;;  %v2059_v51 = vld [vmem:[#allocation2 + $0x284] ss:$8 sps:$4 sm:$0xff]  }
  0x34   :  { %v167_v19 = vrot.slane %v162_v16, %v2318_v17  ;;  %v174_v21 = vrot.slane %v169_v18, %v2318_v17 }
  0x36   :  { %385 = vmatpush1.bf16.msra.mxu1 %v1955_v22  ;;  %662 = vmatpush1.bf16.msra.mxu0 %v2002_v52  ;;  %v2057_v52 = vld [vmem:[#allocation2 + $0x280] ss:$8 sps:$4 sm:$0xff]  }
  0x37   :  { %386 = vmatprep.subr.bf16.mxu1 %v1960_v23  ;;  %663 = vmatprep.subr.bf16.mxu0 %v2003_v53  ;;  %v2062_v53 = vld [vmem:[#allocation2 + $0x294] ss:$8 sps:$4 sm:$0xff]  }
  0x3a   :  { %387 = vmatpush1.bf16.msra.mxu1 %v1958_v24  ;;  %664 = vmatpush1.bf16.msra.mxu0 %v2005_v54  ;;  %v2060_v54 = vld [vmem:[#allocation2 + $0x290] ss:$8 sps:$4 sm:$0xff]  }
  0x3b   :  { %388 = vmatprep.subr.bf16.mxu1 %v1963_v25  ;;  %665 = vmatprep.subr.bf16.mxu0 %v2006_v55  ;;  %v2065_v55 = vld [vmem:[#allocation2 + $0x2a4] ss:$8 sps:$4 sm:$0xff]  }
  0x3e   :  { %389 = vmatpush1.bf16.msra.mxu1 %v1961_v26  ;;  %666 = vmatpush1.bf16.msra.mxu0 %v2008_v56  ;;  %v2063_v56 = vld [vmem:[#allocation2 + $0x2a0] ss:$8 sps:$4 sm:$0xff]  }
  0x3f   :  { %390 = vmatprep.subr.bf16.mxu1 %v1966_v27  ;;  %667 = vmatprep.subr.bf16.mxu0 %v2009_v57  ;;  %v2068_v57 = vld [vmem:[#allocation2 + $0x2b4] ss:$8 sps:$4 sm:$0xff]  }
  0x42   :  { %391 = vmatpush1.bf16.msra.mxu1 %v1964_v28  ;;  %668 = vmatpush1.bf16.msra.mxu0 %v2011_v58  ;;  %v2066_v58 = vld [vmem:[#allocation2 + $0x2b0] ss:$8 sps:$4 sm:$0xff]  }
  0x43   :  { %392 = vmatprep.subr.bf16.mxu1 %v1969_v29  ;;  %669 = vmatprep.subr.bf16.mxu0 %v2012_v59  ;;  %v2071_v59 = vld [vmem:[#allocation2 + $0x2c4] ss:$8 sps:$4 sm:$0xff]  }
  0x46   :  { %393 = vmatpush1.bf16.msra.mxu1 %v1967_v30  ;;  %670 = vmatpush1.bf16.msra.mxu0 %v2014_v60  ;;  %v2069_v60 = vld [vmem:[#allocation2 + $0x2c0] ss:$8 sps:$4 sm:$0xff]  }
  0x47   :  { %394 = vmatprep.subr.bf16.mxu1 %v1972_v31  ;;  %671 = vmatprep.subr.bf16.mxu0 %v2015_v61  ;;  %v2027_v31 = vld [vmem:[#allocation2 + $0x1e4] ss:$8 sps:$4 sm:$0xff]   ;;  %v2074_v61 = vld [vmem:[#allocation2 + $0x2d4] ss:$8 sps:$4 sm:$0xff]  }
  0x4a   :  { %395 = vmatpush1.bf16.msra.mxu1 %v1970_v32  ;;  %672 = vmatpush1.bf16.msra.mxu0 %v2017_v62  ;;  %v2029_v32 = vld [vmem:[#allocation2 + $0x1e0] ss:$8 sps:$4 sm:$0xff]   ;;  %v2072_v62 = vld [vmem:[#allocation2 + $0x2d0] ss:$8 sps:$4 sm:$0xff]  }
  0x4b   :  { %396 = vmatprep.subr.bf16.mxu1 %v1975_v33  ;;  %673 = vmatprep.subr.bf16.mxu0 %v2018_v63  ;;  %v2030_v33 = vld [vmem:[#allocation2 + $0x1f4] ss:$8 sps:$4 sm:$0xff]   ;;  %v1725_v63 = vld.sshfl [vmem:[%s2491_s6] sm:$0x11 pattern:$0x75316420] }
  0x4e   :  { %397 = vmatpush1.bf16.msra.mxu1 %v1973_v34  ;;  %674 = vmatpush1.bf16.msra.mxu0 %v2020_v1  ;;  %v2032_v34 = vld [vmem:[#allocation2 + $0x1f0] ss:$8 sps:$4 sm:$0xff]   ;;  %v423_v1 = vcombine.high %v1725_v63, %v1725_v63 }
  0x4f   :  { %398 = vmatprep.subr.bf16.mxu1 %v1978_v35  ;;  %675 = vmatprep.subr.bf16.mxu0 %v2021_v2  ;;  %v2033_v35 = vld [vmem:[#allocation2 + $0x200] ss:$8 sps:$4 sm:$0xff]   ;;  %v430_v2 = vrot.slane %v1725_v63, %v2314_v12 }
  0x52   :  { %399 = vmatpush1.bf16.msra.mxu1 %v1976_v36  ;;  %676 = vmatpush1.bf16.msra.mxu0 %v2023_v3  ;;  %v2035_v36 = vld [vmem:[#allocation2 + $0x204] ss:$8 sps:$4 sm:$0xff]   ;;  %v437_v3 = vrot.slane %v423_v1, %v2314_v12 }
  0x53   :  { %400 = vmatprep.subr.bf16.mxu1 %v1981_v37  ;;  %677 = vmatprep.subr.bf16.mxu0 %v2024_v4  ;;  %v2038_v37 = vld [vmem:[#allocation2 + $0x214] ss:$8 sps:$4 sm:$0xff]   ;;  %v439_v4 = vpack.i.b16 %v430_v2, %v430_v2 }
  0x55   :  { %v444_v6 = vrot.slane %v439_v4, %v2318_v17 }
  0x56   :  { %401 = vmatpush1.bf16.msra.mxu1 %v1979_v38  ;;  %678 = vmatpush1.bf16.msra.mxu0 %v2026_v5  ;;  %v2036_v38 = vld [vmem:[#allocation2 + $0x210] ss:$8 sps:$4 sm:$0xff]   ;;  %v446_v5 = vpack.i.b16 %v437_v3, %v437_v3 }
  0x57   :  { %402 = vmatprep.subr.bf16.mxu1 %v1984_v39  ;;  %679 = vmatprep.subr.bf16.mxu0 %v2027_v31  ;;  %v2041_v39 = vld [vmem:[#allocation2 + $0x224] ss:$8 sps:$4 sm:$0xff]   ;;  %v2090_v31 = vld [vmem:[#allocation2 + $0x330] ss:$8 sps:$4 sm:$0xff]  }
  0x58   :  { %v451_v8 = vrot.slane %v446_v5, %v2318_v17 }
  0x5a   :  { %403 = vmatpush1.bf16.msra.mxu1 %v1982_v40  ;;  %680 = vmatpush1.bf16.msra.mxu0 %v2029_v32  ;;  %v2039_v40 = vld [vmem:[#allocation2 + $0x220] ss:$8 sps:$4 sm:$0xff]   ;;  %v2095_v32 = vld [vmem:[#allocation2 + $0x344] ss:$8 sps:$4 sm:$0xff]  }
  0x5b   :  { %681 = vmatprep.subr.bf16.mxu0 %v2030_v33  ;;  %930 = vmatprep.subr.bf16.mxu1 %v2035_v36  ;;  %v2093_v33 = vld [vmem:[#allocation2 + $0x340] ss:$8 sps:$4 sm:$0xff]   ;;  %v2101_v36 = vld [vmem:[#allocation2 + $0x364] ss:$8 sps:$4 sm:$0xff]  }
  0x5e   :  { %682 = vmatpush1.bf16.msra.mxu0 %v2032_v34  ;;  %v2098_v34 = vld [vmem:[#allocation2 + $0x354] ss:$8 sps:$4 sm:$0xff]  }
  0xf0   :  { %v129_v20 = vpop.f32.mrb[0].mxu1 }
  0xf1   :  { %v136_v22 = vpack.c.bf16 %v129_v20, %v129_v20  ;;  %v131_v23 = vpop.f32.mrb[1].mxu1  ;;  %v2077_v20 = vld [vmem:[#allocation2 + $0x2e4] ss:$8 sps:$4 sm:$0xff]  }
  0xf2   :  { %v137_v24 = vpack.c.bf16 %v131_v23, %v131_v23  ;;  %v133_v25 = vpop.f32.mrb[2].mxu1  ;;  %v2078_v23 = vld [vmem:[#allocation2 + $0x2f0] ss:$8 sps:$4 sm:$0xff]  }
  0xf3   :  { %v175_v26 = vadd.bf16 %v167_v19, %v136_v22  ;;  %v134_v27 = vpop.f32.mrb[3].mxu1  ;;  %v2080_v22 = vld [vmem:[#allocation2 + $0x2f4] ss:$8 sps:$4 sm:$0xff]   ;;  %v2083_v25 = vld [vmem:[#allocation2 + $0x304] ss:$8 sps:$4 sm:$0xff]  }
  0xf4   :  { %v176_v28 = vadd.bf16 %v174_v21, %v137_v24  ;;  %v2075_v21 = vld [vmem:[#allocation2 + $0x2e0] ss:$8 sps:$4 sm:$0xff]   ;;  %1209 = vmatprep.subr.bf16.mxu0 %v2083_v25  ;;  %v2084_v27 = vld [vmem:[#allocation2 + $0x310] ss:$8 sps:$4 sm:$0xff]  }
  0xf5   :  { %v177_v30 = vmax.bf16 %v2208_v0, %v175_v26  ;;  %v2081_v24 = vld [vmem:[#allocation2 + $0x300] ss:$8 sps:$4 sm:$0xff]   ;;  %v2086_v26 = vld [vmem:[#allocation2 + $0x314] ss:$8 sps:$4 sm:$0xff]  }
  0xf6   :  { %v178_v29 = vmax.bf16 %v2208_v0, %v176_v28  ;;  %v2089_v28 = vld [vmem:[#allocation2 + $0x324] ss:$8 sps:$4 sm:$0xff]  }
  0xf7   :  { %v1793_v25 = vld.sshfl [vmem:[%s2491_s6 + $0x4] sm:$0x11 pattern:$0x75316420] }
  0xf8   :  { %404 = vmatprep.mubr.bf16.mxu1 %v178_v29  ;;  %v2087_v29 = vld [vmem:[#allocation2 + $0x320] ss:$8 sps:$4 sm:$0xff]  }
  0xf9   :  { %405 = vmatmul.mubr.bf16.vlgmr.msra.gmra.mrb[4].mxu1 %v177_v30  ;;  %v2092_v30 = vld [vmem:[#allocation2 + $0x334] ss:$8 sps:$4 sm:$0xff]  }
  0xfa   :  { %931 = vmatpush1.bf16.msra.mxu1 %v2033_v35  ;;  %v2096_v35 = vld [vmem:[#allocation2 + $0x350] ss:$8 sps:$4 sm:$0xff]  }
  0xfb   :  { %932 = vmatprep.subr.bf16.mxu1 %v2038_v37  ;;  %v2099_v37 = vld [vmem:[#allocation2 + $0x360] ss:$8 sps:$4 sm:$0xff]  }
  0xfe   :  { %933 = vmatpush1.bf16.msra.mxu1 %v2036_v38  ;;  %v2104_v38 = vld [vmem:[#allocation2 + $0x374] ss:$8 sps:$4 sm:$0xff]  }
  0xff   :  { %934 = vmatprep.subr.bf16.mxu1 %v2041_v39  ;;  %v2102_v39 = vld [vmem:[#allocation2 + $0x370] ss:$8 sps:$4 sm:$0xff]  }
 0x102   :  { %935 = vmatpush1.bf16.msra.mxu1 %v2039_v40  ;;  %v2107_v40 = vld [vmem:[#allocation2 + $0x384] ss:$8 sps:$4 sm:$0xff]  }
 0x103   :  { %936 = vmatprep.subr.bf16.mxu1 %v2044_v41  ;;  %v2105_v41 = vld [vmem:[#allocation2 + $0x380] ss:$8 sps:$4 sm:$0xff]  }
 0x106   :  { %937 = vmatpush1.bf16.msra.mxu1 %v2042_v42  ;;  %v2110_v42 = vld [vmem:[#allocation2 + $0x394] ss:$8 sps:$4 sm:$0xff]  }
 0x107   :  { %938 = vmatprep.subr.bf16.mxu1 %v2047_v43  ;;  %v2108_v43 = vld [vmem:[#allocation2 + $0x390] ss:$8 sps:$4 sm:$0xff]  }
 0x10a   :  { %939 = vmatpush1.bf16.msra.mxu1 %v2045_v44  ;;  %v2113_v44 = vld [vmem:[#allocation2 + $0x3a4] ss:$8 sps:$4 sm:$0xff]  }
 0x10b   :  { %940 = vmatprep.subr.bf16.mxu1 %v2050_v45  ;;  %v2111_v45 = vld [vmem:[#allocation2 + $0x3a0] ss:$8 sps:$4 sm:$0xff]  }
 0x10e   :  { %941 = vmatpush1.bf16.msra.mxu1 %v2048_v46  ;;  %v2116_v46 = vld [vmem:[#allocation2 + $0x3b4] ss:$8 sps:$4 sm:$0xff]  }
 0x10f   :  { %942 = vmatprep.subr.bf16.mxu1 %v2053_v47  ;;  %v2114_v47 = vld [vmem:[#allocation2 + $0x3b0] ss:$8 sps:$4 sm:$0xff]  }
 0x112   :  { %943 = vmatpush1.bf16.msra.mxu1 %v2051_v48  ;;  %v2119_v48 = vld [vmem:[#allocation2 + $0x3c4] ss:$8 sps:$4 sm:$0xff]  }
 0x113   :  { %944 = vmatprep.subr.bf16.mxu1 %v2056_v49  ;;  %v2117_v49 = vld [vmem:[#allocation2 + $0x3c0] ss:$8 sps:$4 sm:$0xff]  }
 0x116   :  { %945 = vmatpush1.bf16.msra.mxu1 %v2054_v50  ;;  %v2122_v50 = vld [vmem:[#allocation2 + $0x3d4] ss:$8 sps:$4 sm:$0xff]  }
 0x117   :  { %946 = vmatprep.subr.bf16.mxu1 %v2059_v51  ;;  %v2120_v51 = vld [vmem:[#allocation2 + $0x3d0] ss:$8 sps:$4 sm:$0xff]  }
 0x11a   :  { %947 = vmatpush1.bf16.msra.mxu1 %v2057_v52  ;;  %v1759_v52 = vld.sshfl [vmem:[%s2491_s6 + $0x2] sm:$0x11 pattern:$0x75316420] }
 0x11b   :  { %948 = vmatprep.subr.bf16.mxu1 %v2062_v53  ;;  %v702_v53 = vcombine.high %v1759_v52, %v1759_v52 }
 0x11e   :  { %949 = vmatpush1.bf16.msra.mxu1 %v2060_v54  ;;  %v709_v54 = vrot.slane %v1759_v52, %v2314_v12 }
 0x11f   :  { %950 = vmatprep.subr.bf16.mxu1 %v2065_v55  ;;  %v716_v55 = vrot.slane %v702_v53, %v2314_v12 }
 0x122   :  { %951 = vmatpush1.bf16.msra.mxu1 %v2063_v56  ;;  %v718_v56 = vpack.i.b16 %v709_v54, %v709_v54 }
 0x123   :  { %952 = vmatprep.subr.bf16.mxu1 %v2068_v57  ;;  %v725_v57 = vpack.i.b16 %v716_v55, %v716_v55 }
 0x126   :  { %953 = vmatpush1.bf16.msra.mxu1 %v2066_v58  ;;  %v723_v58 = vrot.slane %v718_v56, %v2318_v17 }
 0x127   :  { %954 = vmatprep.subr.bf16.mxu1 %v2071_v59 }
 0x12a   :  { %955 = vmatpush1.bf16.msra.mxu1 %v2069_v60  ;;  %v730_v60 = vrot.slane %v725_v57, %v2318_v17 }
 0x12b   :  { %956 = vmatprep.subr.bf16.mxu1 %v2074_v61 }
 0x12e   :  { %957 = vmatpush1.bf16.msra.mxu1 %v2072_v62 }
 0x12f   :  { %958 = vmatprep.subr.bf16.mxu1 %v2077_v20  ;;  %v2136_v20 = vld [vmem:[%s2492_s7 + $0x18] sm:$0xff]  }
 0x132   :  { %959 = vmatpush1.bf16.msra.mxu1 %v2075_v21  ;;  %v2137_v21 = vld [vmem:[%s2492_s7 + $0x60] sm:$0xff]  }
 0x133   :  { %960 = vmatprep.subr.bf16.mxu1 %v2080_v22  ;;  %v2138_v22 = vld [vmem:[%s2492_s7 + $0x20] sm:$0xff]  }
 0x136   :  { %961 = vmatpush1.bf16.msra.mxu1 %v2078_v23  ;;  %v2139_v23 = vld [vmem:[%s2492_s7 + $0x68] sm:$0xff]  }
 0x1cc   :  { %v406_v7 = vpop.f32.mrb[4].mxu1 }
 0x1cd   :  { %v413_v9 = vpack.c.bf16 %v406_v7, %v406_v7  ;;  %v408_v10 = vpop.f32.mrb[5].mxu1  ;;  %v2125_v7 = vld [vmem:[#allocation2 + $0x3e4] ss:$8 sps:$4 sm:$0xff]  }
 0x1ce   :  { %v414_v11 = vpack.c.bf16 %v408_v10, %v408_v10  ;;  %v410_v13 = vpop.f32.mrb[6].mxu1  ;;  %v2126_v10 = vld [vmem:[#allocation2 + $0x3f0] ss:$8 sps:$4 sm:$0xff]  }
 0x1cf   :  { %v452_v14 = vadd.bf16 %v444_v6, %v413_v9  ;;  %v411_v15 = vpop.f32.mrb[7].mxu1  ;;  %v2128_v9 = vld [vmem:[#allocation2 + $0x3f4] ss:$8 sps:$4 sm:$0xff]   ;;  %v2130_v13 = vld [vmem:[%s2492_s7] sm:$0xff]  }
 0x1d0   :  { %v453_v16 = vadd.bf16 %v451_v8, %v414_v11  ;;  %v2123_v8 = vld [vmem:[#allocation2 + $0x3e0] ss:$8 sps:$4 sm:$0xff]  }
 0x1d1   :  { %v454_v19 = vmax.bf16 %v2208_v0, %v452_v14  ;;  %v2129_v11 = vld [vmem:[%s2492_s7 + $0x40] sm:$0xff]   ;;  %v2131_v14 = vld [vmem:[%s2492_s7 + $0x48] sm:$0xff]  }
 0x1d2   :  { %v455_v18 = vmax.bf16 %v2208_v0, %v453_v16  ;;  %1858 = vmatprep.subr.bf16.mxu1 %v2129_v11  ;;  %v2132_v15 = vld [vmem:[%s2492_s7 + $0x8] sm:$0xff]   ;;  %v2133_v16 = vld [vmem:[%s2492_s7 + $0x50] sm:$0xff]  }
 0x1d4   :  { %683 = vmatprep.mubr.bf16.mxu0 %v455_v18  ;;  %v2134_v18 = vld [vmem:[%s2492_s7 + $0x10] sm:$0xff]  }
 0x1d5   :  { %684 = vmatmul.mubr.bf16.vlgmr.msra.gmra.mrb[0].mxu0 %v454_v19  ;;  %v2135_v19 = vld [vmem:[%s2492_s7 + $0x58] sm:$0xff]  }
 0x1d6   :  { %1210 = vmatpush1.bf16.msra.mxu0 %v2081_v24  ;;  %v2140_v24 = vld [vmem:[%s2492_s7 + $0x28] sm:$0xff]  }
 0x1d7   :  { %1211 = vmatprep.subr.bf16.mxu0 %v2086_v26  ;;  %v981_v26 = vcombine.high %v1793_v25, %v1793_v25 }
 0x1da   :  { %1212 = vmatpush1.bf16.msra.mxu0 %v2084_v27  ;;  %v988_v27 = vrot.slane %v1793_v25, %v2314_v12  ;;  %v2155_v25 = vld [vmem:[%s2496_s11 + $0x30] sm:$0xff]  }
 0x1db   :  { %1213 = vmatprep.subr.bf16.mxu0 %v2089_v28  ;;  %v995_v28 = vrot.slane %v981_v26, %v2314_v12  ;;  %v2156_v26 = vld [vmem:[%s2496_s11 + $0x38] sm:$0xff]  }
 0x1de   :  { %1214 = vmatpush1.bf16.msra.mxu0 %v2087_v29  ;;  %v997_v29 = vpack.i.b16 %v988_v27, %v988_v27  ;;  %v1480_v27 = vld [vmem:[%s2495_s10] sm:$0x1] }
 0x1df   :  { %1215 = vmatprep.subr.bf16.mxu0 %v2092_v30  ;;  %v1004_v30 = vpack.i.b16 %v995_v28, %v995_v28  ;;  %v1551_v28 = vpack.i.b16 %v1480_v27, %v1480_v27 }
 0x1e2   :  { %1216 = vmatpush1.bf16.msra.mxu0 %v2090_v31  ;;  %v1002_v31 = vrot.slane %v997_v29, %v2318_v17  ;;  %v1556_v29 = vrot.slane %v1551_v28, %v2318_v17 }
 0x1e3   :  { %1217 = vmatprep.subr.bf16.mxu0 %v2095_v32 }
 0x1e6   :  { %1218 = vmatpush1.bf16.msra.mxu0 %v2093_v33  ;;  %v1009_v33 = vrot.slane %v1004_v30, %v2318_v17 }
 0x1e7   :  { %1219 = vmatprep.subr.bf16.mxu0 %v2098_v34 }
 0x1ea   :  { %1220 = vmatpush1.bf16.msra.mxu0 %v2096_v35 }
 0x1eb   :  { %1221 = vmatprep.subr.bf16.mxu0 %v2101_v36 }
 0x1ee   :  { %1222 = vmatpush1.bf16.msra.mxu0 %v2099_v37 }
 0x1ef   :  { %1223 = vmatprep.subr.bf16.mxu0 %v2104_v38 }
 0x1f2   :  { %1224 = vmatpush1.bf16.msra.mxu0 %v2102_v39 }
 0x1f3   :  { %1225 = vmatprep.subr.bf16.mxu0 %v2107_v40 }
 0x1f6   :  { %1226 = vmatpush1.bf16.msra.mxu0 %v2105_v41 }
 0x1f7   :  { %1227 = vmatprep.subr.bf16.mxu0 %v2110_v42 }
 0x1fa   :  { %1228 = vmatpush1.bf16.msra.mxu0 %v2108_v43  ;;  %v2141_v43 = vld [vmem:[%s2492_s7 + $0x70] sm:$0xff]  }
 0x1fb   :  { %1229 = vmatprep.subr.bf16.mxu0 %v2113_v44  ;;  %v2142_v44 = vld [vmem:[%s2492_s7 + $0x30] sm:$0xff]  }
 0x1fe   :  { %1230 = vmatpush1.bf16.msra.mxu0 %v2111_v45  ;;  %v2143_v45 = vld [vmem:[%s2492_s7 + $0x78] sm:$0xff]  }
 0x1ff   :  { %1231 = vmatprep.subr.bf16.mxu0 %v2116_v46  ;;  %v2144_v46 = vld [vmem:[%s2492_s7 + $0x38] sm:$0xff]  }
 0x202   :  { %1232 = vmatpush1.bf16.msra.mxu0 %v2114_v47  ;;  %v2145_v47 = vld [vmem:[%s2494_s9] sm:$0xff]  }
 0x203   :  { %1233 = vmatprep.subr.bf16.mxu0 %v2119_v48  ;;  %v2210_v48 = vmov 0.0  }
 0x206   :  { %1234 = vmatpush1.bf16.msra.mxu0 %v2117_v49  ;;  %v2146_v49 = vld [vmem:[%s2494_s9 + $0x8] sm:$0xff]  }
 0x207   :  { %1235 = vmatprep.subr.bf16.mxu0 %v2122_v50  ;;  %v1827_v50 = vld.sshfl [vmem:[%s2491_s6 + $0x6] sm:$0x11 pattern:$0x75316420] }
 0x208   :  { %v1267_v52 = vrot.slane %v1827_v50, %v2314_v12 }
 0x20a   :  { %1236 = vmatpush1.bf16.msra.mxu0 %v2120_v51  ;;  %v1260_v51 = vcombine.high %v1827_v50, %v1827_v50  ;;  %v1276_v54 = vpack.i.b16 %v1267_v52, %v1267_v52 }
 0x20b   :  { %1237 = vmatprep.subr.bf16.mxu0 %v2125_v7 }
 0x20c   :  { %v1274_v53 = vrot.slane %v1260_v51, %v2314_v12  ;;  %v1281_v56 = vrot.slane %v1276_v54, %v2318_v17  ;;  %v2147_v12 = vld [vmem:[%s2494_s9 + $0x10] sm:$0xff]  }
 0x20e   :  { %1238 = vmatpush1.bf16.msra.mxu0 %v2123_v8  ;;  %v1283_v55 = vpack.i.b16 %v1274_v53, %v1274_v53 }
 0x20f   :  { %1239 = vmatprep.subr.bf16.mxu0 %v2128_v9 }
 0x212   :  { %1240 = vmatpush1.bf16.msra.mxu0 %v2126_v10 }
 0x213   :  { %1894 = vmatprep.subr.bf16.mxu0 %v2210_v48 }
 0x2a8   :  { %v685_v59 = vpop.f32.mrb[0].mxu0 }
 0x2a9   :  { %v692_v61 = vpack.c.bf16 %v685_v59, %v685_v59  ;;  %v687_v62 = vpop.f32.mrb[1].mxu0 }
 0x2aa   :  { %v693_v63 = vpack.c.bf16 %v687_v62, %v687_v62  ;;  %v689_v1 = vpop.f32.mrb[2].mxu0 }
 0x2ab   :  { %v731_v2 = vadd.bf16 %v723_v58, %v692_v61  ;;  %v690_v3 = vpop.f32.mrb[3].mxu0  ;;  %v1288_v58 = vrot.slane %v1283_v55, %v2318_v17 }
 0x2ac   :  { %v732_v4 = vadd.bf16 %v730_v60, %v693_v63 }
 0x2ad   :  { %v733_v6 = vmax.bf16 %v2208_v0, %v731_v2 }
 0x2ae   :  { %v734_v5 = vmax.bf16 %v2208_v0, %v732_v4 }
 0x2b0   :  { %962 = vmatprep.mubr.bf16.mxu1 %v734_v5  ;;  %v2148_v5 = vld [vmem:[%s2494_s9 + $0x18] sm:$0xff]  }
 0x2b1   :  { %963 = vmatmul.mubr.bf16.vlgmr.msra.gmra.mrb[8].mxu1 %v733_v6  ;;  %v1325_v6 = vld [vmem:[%s2493_s8] sm:$0x1] }
 0x2b2   :  { %1859 = vmatpush3.bf16.msra.mxu1 %v2130_v13  ;;  %v1464_v7 = vpack.i.b16 %v1325_v6, %v1325_v6 }
 0x2b3   :  { %1860 = vmatprep.subr.bf16.mxu1 %v2131_v14 }
 0x2b4   :  { %v1469_v11 = vrot.slane %v1464_v7, %v2318_v17 }
 0x2b6   :  { %1861 = vmatpush3.bf16.msra.mxu1 %v2132_v15 }
 0x2b7   :  { %1862 = vmatprep.subr.bf16.mxu1 %v2133_v16 }
 0x2ba   :  { %1863 = vmatpush3.bf16.msra.mxu1 %v2134_v18  ;;  %v2149_v18 = vld [vmem:[%s2496_s11] sm:$0xff]  }
 0x2bb   :  { %1864 = vmatprep.subr.bf16.mxu1 %v2135_v19 }
 0x2be   :  { %1865 = vmatpush3.bf16.msra.mxu1 %v2136_v20  ;;  %v2150_v20 = vld [vmem:[%s2496_s11 + $0x8] sm:$0xff]  }
 0x2bf   :  { %1866 = vmatprep.subr.bf16.mxu1 %v2137_v21  ;;  %v2151_v21 = vld [vmem:[%s2496_s11 + $0x10] sm:$0xff]  }
 0x2c2   :  { %1867 = vmatpush3.bf16.msra.mxu1 %v2138_v22  ;;  %v2152_v22 = vld [vmem:[%s2496_s11 + $0x18] sm:$0xff]  }
 0x2c3   :  { %1868 = vmatprep.subr.bf16.mxu1 %v2139_v23  ;;  %v2153_v23 = vld [vmem:[%s2496_s11 + $0x20] sm:$0xff]  }
 0x2c6   :  { %1869 = vmatpush3.bf16.msra.mxu1 %v2140_v24  ;;  %v2154_v24 = vld [vmem:[%s2496_s11 + $0x28] sm:$0xff]   ;;  %s2212_s11 = smov [#allocation5]  }
 0x2c7   :  { %1870 = vmatprep.subr.bf16.mxu1 %v2141_v43  ;;  %s1678_s5 = sshll.u32 %s2212_s11, 4  ;;  %s1679_s5 = int_to_ptr.vmem [resolvable:$true] %s1678_s5 }
 0x2c8   :  { %s2179_s10 = scalar_lea.vmem %s1679_s5, 128  ;;  %p2184_p9 = scmp.lt.s32.totalorder %s1679_s5, %s1679_s5 }
 0x2c9   :  { %p2180_p8 = scmp.ne.s32.totalorder %s1679_s5, %s2179_s10  ;;  %p2185_p10 = scmp.lt.s32.totalorder %s2179_s10, %s2179_s10 }
 0x2ca   :  { %1871 = vmatpush3.bf16.msra.mxu1 %v2142_v44 }
 0x2cb   :  { %1872 = vmatprep.subr.bf16.mxu1 %v2143_v45  ;;  %p2186_p11 = por %p2185_p10, %p2184_p9 }
 0x2cd   :  { %p2187_p12 = pnand %p2186_p11, %p2180_p8 }
 0x2ce   :  { %1873 = vmatpush3.bf16.msra.mxu1 %v2144_v46 }
 0x384   :  { %v964_v32 = vpop.f32.mrb[8].mxu1 }
 0x385   :  { %v971_v34 = vpack.c.bf16 %v964_v32, %v964_v32  ;;  %v966_v35 = vpop.f32.mrb[9].mxu1 }
 0x386   :  { %v972_v36 = vpack.c.bf16 %v966_v35, %v966_v35  ;;  %v968_v37 = vpop.f32.mrb[10].mxu1 }
 0x387   :  { %v1010_v38 = vadd.bf16 %v1002_v31, %v971_v34  ;;  %v969_v39 = vpop.f32.mrb[11].mxu1  ;;  %v1849_v37 = vld [vmem:[%s2497_s12] ss:$0 sm:$0xff] }
 0x388   :  { %v1011_v40 = vadd.bf16 %v1009_v33, %v972_v36 }
 0x389   :  { %v1012_v42 = vmax.bf16 %v2208_v0, %v1010_v38 }
 0x38a   :  { %v1013_v41 = vmax.bf16 %v2208_v0, %v1011_v40 }
 0x38c   :  { %1241 = vmatprep.mubr.bf16.mxu0 %v1013_v41 }
 0x38d   :  { %1242 = vmatmul.mubr.bf16.vlgmr.msra.gmra.mrb[4].mxu0 %v1012_v42 }
 0x38e   :  { %1895 = vmatpush3.bf16.msra.mxu0 %v2145_v47  ;;  %1902 = vmatprep.mubr.msk.bf16.mxu0 %vm2211_vm1, %v2210_v48 }
 0x38f   :  { %1896 = vmatprep.subr.bf16.mxu0 %v2210_v48 }
 0x392   :  { %1897 = vmatpush3.bf16.msra.mxu0 %v2146_v49 }
 0x393   :  { %1898 = vmatprep.subr.bf16.mxu0 %v2210_v48 }
 0x396   :  { %1899 = vmatpush3.bf16.msra.mxu0 %v2147_v12 }
 0x397   :  { %1900 = vmatprep.subr.bf16.mxu0 %v2210_v48 }
 0x39a   :  { %1901 = vmatpush3.bf16.msra.mxu0 %v2148_v5 }
 0x39b   :  { %1906 = vmatprep.subr.bf16.mxu0 %v2210_v48 }
 0x460   :  { %v1243_v57 = vpop.f32.mrb[4].mxu0 }
 0x461   :  { %v1250_v59 = vpack.c.bf16 %v1243_v57, %v1243_v57  ;;  %v1245_v60 = vpop.f32.mrb[5].mxu0 }
 0x462   :  { %v1251_v61 = vpack.c.bf16 %v1245_v60, %v1245_v60  ;;  %v1247_v62 = vpop.f32.mrb[6].mxu0 }
 0x463   :  { %v1289_v63 = vadd.bf16 %v1281_v56, %v1250_v59  ;;  %v1248_v1 = vpop.f32.mrb[7].mxu0 }
 0x464   :  { %v1290_v2 = vadd.bf16 %v1288_v58, %v1251_v61 }
 0x465   :  { %v1291_v4 = vmax.bf16 %v2208_v0, %v1289_v63 }
 0x466   :  { %v1292_v3 = vmax.bf16 %v2208_v0, %v1290_v2 }
 0x468   :  { %1454 = vmatprep.mubr.bf16.mxu1 %v1292_v3 }
 0x469   :  { %1455 = vmatmul.mubr.bf16.vlgmr.msra.gmra.mrb[12].mxu1 %v1291_v4 }
 0x53c   :  { %v1874_v8 = vpop.f32.mrb[12].mxu1 }
 0x53d   :  { %v1875_v9 = vpop.f32.mrb[13].mxu1 }
 0x53e   :  { %v1876_v10 = vadd.f32 %v1875_v9, %v1874_v8  ;;  %v1877_v13 = vpop.f32.mrb[14].mxu1 }
 0x53f   :  { %v1878_v14 = vpop.f32.mrb[15].mxu1 }
 0x540   :  { %v1462_v15 = vpack.c.bf16 %v1876_v10, %v1876_v10 }
 0x542   :  { %v1470_v16 = vadd.bf16 %v1469_v11, %v1462_v15 }
 0x544   :  { %v1471_v19 = vmax.bf16 %v2208_v0, %v1470_v16 }
 0x546   :  { %1903 = vmatmul.mubr.msk.bf16.vlgmr.msra.gmra.mrb[8].mxu0 %vm1505_vm2, %v1471_v19 }
 0x547   :  { %1907 = vmatpush3.bf16.msra.mxu0 %v2149_v18  ;;  %1922 = vmatprep.mubr.msk.bf16.mxu0 %vm2211_vm1, %v2210_v48 }
 0x548   :  { %1908 = vmatprep.subr.bf16.mxu0 %v2210_v48 }
 0x54b   :  { %1909 = vmatpush3.bf16.msra.mxu0 %v2150_v20 }
 0x54c   :  { %1910 = vmatprep.subr.bf16.mxu0 %v2210_v48 }
 0x54f   :  { %1911 = vmatpush3.bf16.msra.mxu0 %v2151_v21 }
 0x550   :  { %1912 = vmatprep.subr.bf16.mxu0 %v2210_v48 }
 0x553   :  { %1913 = vmatpush3.bf16.msra.mxu0 %v2152_v22 }
 0x554   :  { %1914 = vmatprep.subr.bf16.mxu0 %v2210_v48 }
 0x557   :  { %1915 = vmatpush3.bf16.msra.mxu0 %v2153_v23 }
 0x558   :  { %1916 = vmatprep.subr.bf16.mxu0 %v2210_v48 }
 0x55b   :  { %1917 = vmatpush3.bf16.msra.mxu0 %v2154_v24 }
 0x55c   :  { %1918 = vmatprep.subr.bf16.mxu0 %v2210_v48 }
 0x55f   :  { %1919 = vmatpush3.bf16.msra.mxu0 %v2155_v25 }
 0x560   :  { %1920 = vmatprep.subr.bf16.mxu0 %v2210_v48 }
 0x563   :  { %1921 = vmatpush3.bf16.msra.mxu0 %v2156_v26 }
 0x619   :  { %v1543_v30 = vpop.f32.mrb[8].mxu0 }
 0x61a   :  { %v1549_v31 = vpack.c.bf16 %v1543_v30, %v1543_v30  ;;  %v1904_v32 = vpop.f32.mrb[9].mxu0 }
 0x61b   :  { %v1546_v33 = vpop.f32.mrb[10].mxu0 }
 0x61c   :  { %v1557_v34 = vadd.bf16 %v1556_v29, %v1549_v31  ;;  %v1905_v35 = vpop.f32.mrb[11].mxu0 }
 0x61e   :  { %v1558_v36 = vmax.bf16 %v2208_v0, %v1557_v34 }
 0x620   :  { %1923 = vmatmul.mubr.bf16.vlgmr.msra.gmra.mrb[12].mxu0 %v1558_v36 }
 0x6f3   :  { %v1664_v38 = vpop.f32.mrb[12].mxu0 }
 0x6f4   :  { %v1665_v39 = vadd.f32 %v1849_v37, %v1664_v38  ;;  %v1924_v40 = vpop.f32.mrb[13].mxu0 }
 0x6f5   :  { %v1667_v17 = vpop.f32.mrb[14].mxu0 }
 0x6f6   :  { %v1925_v41 = vpop.f32.mrb[15].mxu0  ;;  %1671 = vst.msk [vmem:[#allocation5] sm:$0xff] %vm1670_vm3, %v1665_v39 }
 0x6f7   :  { %2190 = shalt.err (!%p2187_p12)
}
 0x6f8   :  { %s2191_s12 = scalar_lea.hbm %s2498_s13, 128 }
 0x6f9   :  { %p2192_p13 = scmp.ne.s32.totalorder %s2498_s13, %s2191_s12  ;;  %p2195_p0 = scmp.lt.u32.totalorder %s2191_s12, %s2498_s13 }
 0x6fb   :  { %p2197_p1 = pnand %p2195_p0, %p2192_p13 }
 0x6fd   :  { %2200 = shalt.err (!%p2197_p1)
}
 0x6fe   :  { %1681 = dma.vmem_to_hbm [thread:$0]  %s1679_s5, 128, %s2498_s13, [#allocation4]  }
 0x6ff   :  { %2203 = dma.done.wait [#allocation4], 128  }
 0x700   :  { %2204 = vsyncadd [#allocation4], 4294967168 }
 0x701   :  { %1685 = vsyncpa [#allocation3], 1 }
 0x702   :  { %1686 = vsyncpa [#allocation4], 1 }

</bundles_post_ra>
